<compile_context>
chip_gen: v7x
topology: tpu7x:2x2x1
jax: 0.10.0
libtpu: 0.0.40
codegen_flags: <defaults>
</compile_context>

<pallas_src>
import functools
import math

import jax
import jax.numpy as jnp
from jax import lax
from jax.experimental import pallas as pl
from jax.experimental.pallas import tpu as pltpu

_LOG2_E = 1.4426950408889634
# Explicit scoped-VMEM limit: comfortably above the tile plan, below v7x's
# 64 MiB physical VMEM (and well below v5e/v6e's 128 MiB).
_VMEM_LIMIT_BYTES = 48 * 1024 * 1024


def _round_up(n, m):
    return ((n + m - 1) // m) * m


def _largest_divisor_block(total, target, granule=8):
    """Largest b <= target with total % b == 0 and b % granule == 0.

    Falls back to `total` (full extent, always legal for the (8,128) rule)."""
    if total <= target:
        return total
    b = (target // granule) * granule
    while b >= granule:
        if total % b == 0:
            return b
        b -= granule
    return total


def _maybe_split_for_cores(total, block, granule=8, min_split_total=256):
    """Prefer >=2 blocks along a 'parallel' grid axis so v7x's 2 TensorCores
    both get work; skip for small axes where one block is already cheap."""
    if total // block >= 2 or total < min_split_total:
        return block
    return _largest_divisor_block(total, max(total // 2, granule), granule)


# --------------------------------------------------------------------------
# Kernel 1: Q projection, q = (x @ wq) * (log2(e)/sqrt(d_out)), once per call.
# --------------------------------------------------------------------------
def _q_proj_kernel(x_ref, wq_ref, q_ref, *, scale):
    q = jnp.dot(x_ref[...], wq_ref[...], preferred_element_type=jnp.float32)
    q_ref[...] = (q * scale).astype(q_ref.dtype)


# --------------------------------------------------------------------------
# Kernel 2: fused K/V projection, one matmul against (Din, 2*Dpad) weight.
# --------------------------------------------------------------------------
def _kv_proj_kernel(emb_ref, wkv_ref, k_ref, v_ref, *, d_pad):
    kv = jnp.dot(emb_ref[...], wkv_ref[...], preferred_element_type=jnp.float32)
    # Lane-aligned (multiple-of-128) split of the fused projection.
    k_ref[...] = kv[:, :d_pad].astype(k_ref.dtype)
    v_ref[...] = kv[:, d_pad:].astype(v_ref.dtype)


# --------------------------------------------------------------------------
# Kernel 3: single-pass attention (all keys in VMEM, no online softmax).
#   log2(e) is already folded into q, so exp2 == softmax's exp.
# --------------------------------------------------------------------------
def _attn_single_pass_kernel(q_ref, k_ref, v_ref, o_ref):
    s = lax.dot_general(
        q_ref[...], k_ref[...],
        dimension_numbers=(((1,), (1,)), ((), ())),   # q @ k.T without XLU transpose
        preferred_element_type=jnp.float32)
    m = jnp.max(s, axis=-1, keepdims=True)
    p = jnp.exp2(s - m)
    l = jnp.sum(p, axis=-1, keepdims=True)
    o = jnp.dot(p.astype(v_ref.dtype), v_ref[...],
                preferred_element_type=jnp.float32)
    o_ref[...] = (o * pl.reciprocal(l, approx=True)).astype(o_ref.dtype)


# --------------------------------------------------------------------------
# Kernel 4: flash-style attention for long encoder sequences.
#   grid = (Sq // block_q, Sk // block_k), key axis innermost ("arbitrary").
# --------------------------------------------------------------------------
def _flash_attn_kernel(q_ref, k_ref, v_ref, o_ref, m_sc, l_sc, acc_sc):
    ki = pl.program_id(1)

    @pl.when(ki == 0)
    def _():
        m_sc[...] = jnp.full_like(m_sc, -jnp.inf)
        l_sc[...] = jnp.zeros_like(l_sc)
        acc_sc[...] = jnp.zeros_like(acc_sc)

    s = lax.dot_general(
        q_ref[...], k_ref[...],
        dimension_numbers=(((1,), (1,)), ((), ())),
        preferred_element_type=jnp.float32)

    m_prev = m_sc[...]
    m_new = jnp.maximum(m_prev, jnp.max(s, axis=-1, keepdims=True))
    alpha = jnp.exp2(m_prev - m_new)          # exp2 everywhere (log2e in scale)
    p = jnp.exp2(s - m_new)
    l_sc[...] = alpha * l_sc[...] + jnp.sum(p, axis=-1, keepdims=True)
    acc_sc[...] = alpha * acc_sc[...] + jnp.dot(
        p.astype(v_ref.dtype), v_ref[...], preferred_element_type=jnp.float32)
    m_sc[...] = m_new

    @pl.when(ki == pl.num_programs(1) - 1)
    def _():
        inv_l = pl.reciprocal(l_sc[...], approx=True)
        o_ref[...] = (acc_sc[...] * inv_l).astype(o_ref.dtype)


# --------------------------------------------------------------------------
# Wrapper
# --------------------------------------------------------------------------
def encoder_decoder_attention(x, embeddings, wquery, wkey, wvalue, *,
                              block_q=512, block_k=2048, block_rows_proj=512,
                              single_pass_max_sk=4096,
                              compute_dtype=jnp.bfloat16,
                              out_dtype=jnp.float32):
    """Pallas implementation of EncoderDecoderAttention.forward.

    Pass out_dtype=jnp.bfloat16 to halve output HBM writeback when the caller
    does not need f32 results.
    """
    sq, d_in = x.shape
    sk, d_in2 = embeddings.shape
    assert d_in == d_in2
    d_out = wquery.shape[1]
    assert wquery.shape == wkey.shape == wvalue.shape == (d_in, d_out)

    # Lane-dense projection / output width: pad d_out up to a multiple of 128.
    d_pad = _round_up(d_out, 128)
    pad = d_pad - d_out

    def prep_w(w):
        w = w.astype(compute_dtype)
        if pad:
            w = jnp.pad(w, ((0, 0), (0, pad)))
        return w

    wq = prep_w(wquery)
    wkv = jnp.concatenate([prep_w(wkey), prep_w(wvalue)], axis=1)  # (d_in, 2*d_pad)
    xc = x.astype(compute_dtype)
    ec = embeddings.astype(compute_dtype)

    # ---- tile geometry (blocks always divide the extent; keep >=2 blocks on
    # 'parallel' axes when the axis is big enough, for v7x's 2 TensorCores). ----
    block_q = _maybe_split_for_cores(sq, _largest_divisor_block(sq, block_q))
    nq = sq // block_q

    single_pass = sk <= single_pass_max_sk
    block_k = sk if single_pass else _largest_divisor_block(sk, block_k)
    nk = sk // block_k
    # TODO(synk): very large prime-ish Sk falls back to a single (huge) key
    # block; proper ragged masking of a partial last block is not implemented.

    bq_proj = _maybe_split_for_cores(sq, _largest_divisor_block(sq, block_rows_proj))
    bk_proj = _maybe_split_for_cores(sk, _largest_divisor_block(sk, block_rows_proj))

    out_isize = jnp.dtype(out_dtype).itemsize
    in_isize = jnp.dtype(compute_dtype).itemsize

    proj_params = pltpu.CompilerParams(
        dimension_semantics=("parallel",), vmem_limit_bytes=_VMEM_LIMIT_BYTES)

    # 1/sqrt(d_out) and log2(e) folded into q once, right after its projection.
    scale = _LOG2_E / math.sqrt(float(d_out))

    # ---- Q projection: computed once, outside the attention hot loop. ----
    q_proj = pl.pallas_call(
        functools.partial(_q_proj_kernel, scale=scale),
        out_shape=jax.ShapeDtypeStruct((sq, d_pad), compute_dtype),
        grid_spec=pltpu.PrefetchScalarGridSpec(
            num_scalar_prefetch=0,
            grid=(sq // bq_proj,),
            in_specs=[pl.BlockSpec((bq_proj, d_in), lambda i: (i, 0)),
                      pl.BlockSpec((d_in, d_pad), lambda i: (0, 0))],
            out_specs=pl.BlockSpec((bq_proj, d_pad), lambda i: (i, 0)),
        ),
        compiler_params=proj_params,
        cost_estimate=pl.CostEstimate(
            flops=2 * sq * d_in * d_pad,
            transcendentals=0,
            bytes_accessed=(sq * d_in + d_in * d_pad + sq * d_pad) * in_isize),
    )(xc, wq)

    # ---- Fused K/V projection: one N=2*d_pad matmul (fills 256-wide MXU). ----
    k_proj, v_proj = pl.pallas_call(
        functools.partial(_kv_proj_kernel, d_pad=d_pad),
        out_shape=(jax.ShapeDtypeStruct((sk, d_pad), compute_dtype),
                   jax.ShapeDtypeStruct((sk, d_pad), compute_dtype)),
        grid_spec=pltpu.PrefetchScalarGridSpec(
            num_scalar_prefetch=0,
            grid=(sk // bk_proj,),
            in_specs=[pl.BlockSpec((bk_proj, d_in), lambda i: (i, 0)),
                      pl.BlockSpec((d_in, 2 * d_pad), lambda i: (0, 0))],
            out_specs=[pl.BlockSpec((bk_proj, d_pad), lambda i: (i, 0)),
                       pl.BlockSpec((bk_proj, d_pad), lambda i: (i, 0))],
        ),
        compiler_params=proj_params,
        cost_estimate=pl.CostEstimate(
            flops=2 * sk * d_in * 2 * d_pad,
            transcendentals=0,
            bytes_accessed=(sk * d_in + d_in * 2 * d_pad + 2 * sk * d_pad) * in_isize),
    )(ec, wkv)

    # ---- Attention. ----
    kv_stream_bytes = (2 * sk * d_pad * in_isize) * (1 if single_pass else nq)
    attn_cost = pl.CostEstimate(
        flops=4 * sq * sk * d_pad,
        transcendentals=sq * sk,
        bytes_accessed=sq * d_pad * in_isize + kv_stream_bytes + sq * d_pad * out_isize)

    if single_pass:
        # All of K/V resident in VMEM: no online-softmax bookkeeping, no
        # "arbitrary" axis, K/V fetched once (block index constant).
        out_pad = pl.pallas_call(
            _attn_single_pass_kernel,
            out_shape=jax.ShapeDtypeStruct((sq, d_pad), out_dtype),
            grid_spec=pltpu.PrefetchScalarGridSpec(
                num_scalar_prefetch=0,
                grid=(nq,),
                in_specs=[
                    pl.BlockSpec((block_q, d_pad), lambda qi: (qi, 0)),
                    pl.BlockSpec((sk, d_pad), lambda qi: (0, 0)),
                    pl.BlockSpec((sk, d_pad), lambda qi: (0, 0)),
                ],
                out_specs=pl.BlockSpec((block_q, d_pad), lambda qi: (qi, 0)),
            ),
            compiler_params=pltpu.CompilerParams(
                dimension_semantics=("parallel",),
                vmem_limit_bytes=_VMEM_LIMIT_BYTES),
            cost_estimate=attn_cost,
        )(q_proj, k_proj, v_proj)
    else:
        # Flash path: query blocks parallel, key blocks arbitrary; deeper
        # K/V pipelining when there are enough key blocks to benefit.
        kv_mode = pl.Buffered(3) if nk >= 3 else pl.Buffered(2)
        out_pad = pl.pallas_call(
            _flash_attn_kernel,
            out_shape=jax.ShapeDtypeStruct((sq, d_pad), out_dtype),
            grid_spec=pltpu.PrefetchScalarGridSpec(
                num_scalar_prefetch=0,
                grid=(nq, nk),
                in_specs=[
                    pl.BlockSpec((block_q, d_pad), lambda qi, ki: (qi, 0)),
                    pl.BlockSpec((block_k, d_pad), lambda qi, ki: (ki, 0),
                                 pipeline_mode=kv_mode),
                    pl.BlockSpec((block_k, d_pad), lambda qi, ki: (ki, 0),
                                 pipeline_mode=kv_mode),
                ],
                out_specs=pl.BlockSpec((block_q, d_pad), lambda qi, ki: (qi, 0)),
                scratch_shapes=[
                    pltpu.VMEM((block_q, 1), jnp.float32),       # running max
                    pltpu.VMEM((block_q, 1), jnp.float32),       # running denom
                    pltpu.VMEM((block_q, d_pad), jnp.float32),   # accumulator
                ],
            ),
            compiler_params=pltpu.CompilerParams(
                dimension_semantics=("parallel", "arbitrary"),
                vmem_limit_bytes=_VMEM_LIMIT_BYTES),
            cost_estimate=attn_cost,
        )(q_proj, k_proj, v_proj)

    return out_pad[:, :d_out] if pad else out_pad


# --------------------------------------------------------------------------
# Reference + test
# --------------------------------------------------------------------------
def _kaiming_normal(key, fan_in, fan_out):
    # torch.nn.init.kaiming_normal_(nonlinearity='relu', mode='fan_in'):
    # std = sqrt(2 / fan_in)
    std = math.sqrt(2.0 / fan_in)
    return std * jax.random.normal(key, (fan_in, fan_out), dtype=jnp.float32)


def _reference(x, emb, wq, wk, wv):
    q = x @ wq
    k = emb @ wk
    v = emb @ wv
    a = (q @ k.T) / jnp.sqrt(jnp.float32(wq.shape[1]))
    p = jax.nn.softmax(a, axis=-1)
    return p @ v


if __name__ == "__main__":
    # Small shapes consistent with the module: input_size=32, output_size=64,
    # 8 decoder tokens, 16 encoder tokens.
    SQ, SK, D_IN, D_OUT = 8, 16, 32, 64

    key = jax.random.PRNGKey(0)
    kx, ke, kq, kk, kv = jax.random.split(key, 5)

    x = jax.random.normal(kx, (SQ, D_IN), dtype=jnp.float32)
    embeddings = jax.random.normal(ke, (SK, D_IN), dtype=jnp.float32)

    wquery = _kaiming_normal(kq, D_IN, D_OUT)
    wkey = _kaiming_normal(kk, D_IN, D_OUT)
    wvalue = _kaiming_normal(kv, D_IN, D_OUT)

    out = encoder_decoder_attention(x, embeddings, wquery, wkey, wvalue)
    out = jax.block_until_ready(out)

    ref = _reference(x, embeddings, wquery, wkey, wvalue)
    assert out.shape == (SQ, D_OUT)
    max_err = float(jnp.max(jnp.abs(out - ref)))
    # bf16 MXU operands + approx reciprocal → looser tolerance than pure f32.
    assert jnp.allclose(out, ref, atol=5e-2, rtol=5e-2), f"max abs err {max_err}"

    print("KERNEL_OK")
</pallas_src>

<mosaic_0001>
module attributes {stable_mosaic.version = 11 : i64} {
  func.func @_q_proj_kernel(%arg0: i32, %arg1: memref<8x32xbf16, #tpu.memory_space<vmem>>, %arg2: memref<32x128xbf16, #tpu.memory_space<vmem>>, %arg3: memref<8x128xbf16, #tpu.memory_space<vmem>>) attributes {dimension_semantics = [#tpu.dimension_semantics<parallel>], iteration_bounds = array<i64: 1>, scalar_prefetch = 0 : i64, scratch_operands = 0 : i64, tpu.core_type = #tpu.core_type<tc>, window_params = [{transform_indices = @transform_0, window_bounds = array<i64: 8, 32>}, {pipeline_mode = #tpu.pipeline_mode<synchronous>, transform_indices = @transform_1, window_bounds = array<i64: 32, 128>}, {transform_indices = @transform_2, window_bounds = array<i64: 8, 128>}]} {
    %c0 = arith.constant 0 : index
    %c0_0 = arith.constant 0 : index
    %0 = vector.load %arg1[%c0, %c0_0] : memref<8x32xbf16, #tpu.memory_space<vmem>>, vector<8x32xbf16>
    %c0_1 = arith.constant 0 : index
    %c0_2 = arith.constant 0 : index
    %1 = vector.load %arg2[%c0_1, %c0_2] : memref<32x128xbf16, #tpu.memory_space<vmem>>, vector<32x128xbf16>
    %cst = arith.constant dense<0.000000e+00> : vector<8x128xf32>
    %2 = tpu.matmul %0, %1, %cst {dimension_numbers = #tpu.dot_dimension_numbers<[1], [0], [0], [1], [0, 0, 1, 1], [], []>} : vector<8x32xbf16>, vector<32x128xbf16>, vector<8x128xf32> -> vector<8x128xf32>
    %cst_3 = arith.constant 0.180336878 : f32
    %3 = vector.broadcast %cst_3 : f32 to vector<8x128xf32>
    %4 = arith.mulf %2, %3 : vector<8x128xf32>
    %5 = arith.truncf %4 : vector<8x128xf32> to vector<8x128xbf16>
    %c0_4 = arith.constant 0 : index
    %c0_5 = arith.constant 0 : index
    %6 = vector.load %arg3[%c0_4, %c0_5] : memref<8x128xbf16, #tpu.memory_space<vmem>>, vector<8x128xbf16>
    tpu.vector_store %arg3[%c0_4, %c0_5], %5 {strides = array<i32>} : memref<8x128xbf16, #tpu.memory_space<vmem>>, vector<8x128xbf16>,
    return
  }
  func.func @transform_0(%arg0: i32) -> (i32, i32) {
    %c0_i32 = arith.constant 0 : i32
    %c0_i32_0 = arith.constant 0 : i32
    return %arg0, %c0_i32 : i32, i32
  }
  func.func @transform_1(%arg0: i32) -> (i32, i32) {
    %c0_i32 = arith.constant 0 : i32
    %c0_i32_0 = arith.constant 0 : i32
    %c0_i32_1 = arith.constant 0 : i32
    return %c0_i32, %c0_i32_0 : i32, i32
  }
  func.func @transform_2(%arg0: i32) -> (i32, i32) {
    %c0_i32 = arith.constant 0 : i32
    %c0_i32_0 = arith.constant 0 : i32
    return %arg0, %c0_i32 : i32, i32
  }
}

</mosaic_0001>

<bundles_post_ra>
// kernel: tpu_custom_call.1
= control target key start
LH: loop header
LB: loop body
LE: loop exit
PB: predicated region body
PF: predicated region fallthrough
CT: control target
= control target key end

     0   :  { %7 = vsyncpa [#allocation3], 0  ;;  %s279_s0 = inlined_call_operand.hbm [shape: bf16[8,32], index: 0, kind: input, shape index: {}]   ;;  %s280_s1 = inlined_call_operand.hbm [shape: bf16[32,128], index: 1, kind: input, shape index: {}]   ;;  %s281_s2 = inlined_call_operand.hbm [shape: bf16[8,128], index: 2, kind: output, shape index: {}]  }
   0x1   :  { %8 = vsyncpa [#allocation6], 0 }
   0x2   :  { %9 = vsyncpa [#allocation4], 0  ;;  %s214_s9 = smov [#allocation2]   ;;  %s215_s11 = smov [#allocation5]  }
   0x3   :  { %s16_s10 = sshll.u32 %s214_s9, 4  ;;  %s25_s12 = sshll.u32 %s215_s11, 4  ;;  %s17_s10 = int_to_ptr.vmem [resolvable:$true] %s16_s10  ;;  %s236_s12 = int_to_ptr.vmem [resolvable:$true] %s25_s12 }
   0x4   :  { %s142_s15 = scalar_lea.hbm %s279_s0, 64 }
   0x5   :  { %p143_p0 = scmp.ne.s32.totalorder %s279_s0, %s142_s15  ;;  %p146_p1 = scmp.lt.u32.totalorder %s142_s15, %s279_s0 }
   0x7   :  { %p148_p2 = pnand %p146_p1, %p143_p0 }
   0x9   :  { %151 = shalt.err (!%p148_p2)
}
   0xa   :  { %s152_s20 = scalar_lea.vmem %s17_s10, 64  ;;  %p157_p4 = scmp.lt.s32.totalorder %s17_s10, %s17_s10 }
   0xb   :  { %p153_p3 = scmp.ne.s32.totalorder %s17_s10, %s152_s20  ;;  %p158_p5 = scmp.lt.s32.totalorder %s152_s20, %s152_s20 }
   0xd   :  { %p159_p6 = por %p158_p5, %p157_p4 }
   0xf   :  { %p160_p7 = pnand %p159_p6, %p153_p3 }
  0x11   :  { %163 = shalt.err (!%p160_p7)
}
  0x12   :  { %19 = dma.hbm_to_vmem [thread:$0]  %s279_s0, 64, %s17_s10, [#allocation3]  }
  0x13   :  { %s164_s25 = scalar_lea.hbm %s280_s1, 256 }
  0x14   :  { %p165_p8 = scmp.ne.s32.totalorder %s280_s1, %s164_s25  ;;  %p168_p9 = scmp.lt.u32.totalorder %s164_s25, %s280_s1 }
  0x16   :  { %p170_p10 = pnand %p168_p9, %p165_p8 }
  0x18   :  { %173 = shalt.err (!%p170_p10)
}
  0x19   :  { %s174_s30 = scalar_lea.vmem %s236_s12, 256  ;;  %p179_p12 = scmp.lt.s32.totalorder %s236_s12, %s236_s12 }
  0x1a   :  { %p175_p11 = scmp.ne.s32.totalorder %s236_s12, %s174_s30  ;;  %p180_p13 = scmp.lt.s32.totalorder %s174_s30, %s174_s30 }
  0x1c   :  { %p181_p0 = por %p180_p13, %p179_p12 }
  0x1e   :  { %p182_p1 = pnand %p181_p0, %p175_p11 }
  0x20   :  { %185 = shalt.err (!%p182_p1)
}
  0x21   :  { %s216_s0 = smov 64   ;;  %s217_s3 = smov 4  }
  0x22   :  { %31 = dma.hbm_to_vmem [thread:$0]  %s280_s1, 256, %s236_s12, [#allocation6], %s216_s0, %s216_s0, %s217_s3  }
  0x23   :  { %208 = dma.done.wait [#allocation3], 64  }
  0x24   :  { %209 = vsyncadd [#allocation3], 4294967232 }
  0x25   :  { %210 = dma.done.wait [#allocation6], 256  }
  0x26   :  { %211 = vsyncadd [#allocation6], 4294967040  ;;  %v218_v0 = vmov 0.0   ;;  %vm219_vm0 = vmmov 0   ;;  %v140_v1 = vld [vmem:[#allocation5] sm:$0xff]   ;;  %v141_v2 = vld [vmem:[#allocation5 + $0x8] sm:$0xff]  }
  0x27   :  { %125 = vmatprep.subr.bf16.mxu0 %v218_v0  ;;  %129 = vmatprep.mubr.msk.bf16.mxu0 %vm219_vm0, %v218_v0  ;;  %v39_v3 = vld [vmem:[#allocation2] sm:$0xf]  ;;  %vm56_vm1 = vcmask 261120   ;;  %s220_s6 = smov [#allocation7]  }
  0x28   :  { %126 = vmatpush3.bf16.msra.mxu0 %v140_v1  ;;  %s109_s7 = sshll.u32 %s220_s6, 4  ;;  %s110_s7 = int_to_ptr.vmem [resolvable:$true] %s109_s7 }
  0x29   :  { %127 = vmatprep.subr.bf16.mxu0 %v218_v0  ;;  %s186_s1 = scalar_lea.vmem %s110_s7, 64  ;;  %p191_p3 = scmp.lt.s32.totalorder %s110_s7, %s110_s7 }
  0x2a   :  { %p187_p2 = scmp.ne.s32.totalorder %s110_s7, %s186_s1  ;;  %p192_p4 = scmp.lt.s32.totalorder %s186_s1, %s186_s1 }
  0x2c   :  { %128 = vmatpush3.bf16.msra.mxu0 %v141_v2  ;;  %p193_p5 = por %p192_p4, %p191_p3 }
  0x2e   :  { %p194_p6 = pnand %p193_p5, %p187_p2 }
  0x2f   :  { %130 = vmatmul.mubr.msk.bf16.vlgmr.msra.gmra.mrb[0].mxu0 %vm56_vm1, %v39_v3 }
 0x102   :  { %v94_v4 = vpop.f32.mrb[0].mxu0 }
 0x103   :  { %v100_v5 = vmul.f32 0.18033688, %v94_v4  ;;  %v131_v6 = vpop.f32.mrb[1].mxu0 }
 0x104   :  { %v97_v7 = vpop.f32.mrb[2].mxu0 }
 0x105   :  { %v101_v8 = vpack.c.bf16 %v100_v5, %v100_v5  ;;  %v132_v9 = vpop.f32.mrb[3].mxu0 }
 0x107   :  { %102 = vst [vmem:[#allocation7] sm:$0xf] %v101_v8 }
 0x108   :  { %197 = shalt.err (!%p194_p6)
}
 0x109   :  { %s198_s10 = scalar_lea.hbm %s281_s2, 64 }
 0x10a   :  { %p199_p7 = scmp.ne.s32.totalorder %s281_s2, %s198_s10  ;;  %p202_p8 = scmp.lt.u32.totalorder %s198_s10, %s281_s2 }
 0x10c   :  { %p204_p9 = pnand %p202_p8, %p199_p7 }
 0x10e   :  { %207 = shalt.err (!%p204_p9)
}
 0x10f   :  { %112 = dma.vmem_to_hbm [thread:$0]  %s110_s7, 64, %s281_s2, [#allocation4]  }
 0x110   :  { %212 = dma.done.wait [#allocation4], 64  }
 0x111   :  { %213 = vsyncadd [#allocation4], 4294967232 }
 0x112   :  { %116 = vsyncpa [#allocation3], 1 }
 0x113   :  { %117 = vsyncpa [#allocation6], 1 }
 0x114   :  { %118 = vsyncpa [#allocation4], 1 }

</bundles_post_ra>
